<compile_context>
chip_gen: v7x
topology: tpu7x:2x2x1
jax: 0.10.0
libtpu: 0.0.40
codegen_flags: <defaults>
</compile_context>

<pallas_src>
import numpy as np
import jax
import jax.numpy as jnp
from jax.experimental import pallas as pl
from jax.experimental.pallas import tpu as pltpu

TAU = 0.5
DELTA = 100.0
TV_LAMBDA = 0.001


def _round_up(x, m):
    return -(-x // m) * m


def _vmem_capacity_bytes():
    try:
        return int(pltpu.get_tpu_info().vmem_capacity_bytes)
    except Exception:
        return 64 * 1024 * 1024  # conservative fallback (v7x per-core VMEM)


def _sublane_min(itemsize):
    # Sub-32-bit dtypes pack along sublanes: bf16 -> 16, int8/fp8 -> 32.
    return {4: 8, 2: 16, 1: 32}.get(int(itemsize), 8)


def _per_row_vmem_bytes(hw, itemsize):
    # Five double-buffered lane-dense input rows per N*C row.
    hw_pad = _round_up(hw, 128)
    return 5 * 2 * hw_pad * int(itemsize)


def _choose_block_nc(nc, hw, itemsize, budget_bytes):
    """Largest divisor of N*C that is a legal sublane tile and fits the budget."""
    sub = _sublane_min(itemsize)
    per_row = _per_row_vmem_bytes(hw, itemsize)
    candidates = [d for d in range(sub, nc + 1, sub) if nc % d == 0]
    if nc not in candidates:
        candidates.append(nc)  # full extent is always a legal block
    candidates = sorted(candidates)
    best = None
    for d in candidates:
        if d * per_row <= budget_bytes:
            best = d
    if best is None:
        best = candidates[0]  # smallest legal tile; vmem_limit is raised to cover it
    return best


def alg2_loss(x_encoded, y_convolved, gen, i, i_convolved, block_nc=None):
    n, c, h, w = i.shape
    nc, hw = n * c, h * w
    assert hw >= 2, "image must have at least 2 pixels"

    itemsize = jnp.dtype(i.dtype).itemsize
    sub = _sublane_min(itemsize)

    vmem_cap = _vmem_capacity_bytes()
    budget = int(vmem_cap * 0.45)  # selection budget; leaves pipeline/compiler headroom

    if block_nc is None:
        block_nc = _choose_block_nc(nc, hw, itemsize, budget)
    assert nc % block_nc == 0, "block_nc must divide N*C"
    assert block_nc == nc or block_nc % sub == 0, (
        f"block_nc must be a multiple of {sub} for {i.dtype} inputs (or all of N*C)")

    steps_total = nc // block_nc
    # v7x has 2 TensorCores; give each its own partial-sum output slot.
    n_par = 2 if (steps_total % 2 == 0 and steps_total >= 2) else 1
    steps = steps_total // n_par
    grid = (n_par, steps)

    # Global (not per-tile) normalization constants, baked in as compile-time floats.
    w_enc = 1.0 / float(x_encoded.size)          # MSE(x_encoded, i_convolved)
    w_enc_delta = DELTA / float(x_encoded.size)  # DELTA * MSE(y_convolved, x_encoded)
    w_img = TAU / float(i.size)                  # TAU * MSE(i, gen)

    # Lane-dense (N*C, H*W) for all five streams.
    xe2 = x_encoded.reshape(nc, hw)
    yc2 = y_convolved.reshape(nc, hw)
    ic2 = i_convolved.reshape(nc, hw)
    gen2 = gen.reshape(nc, hw)
    img2 = i.reshape(nc, hw)

    # TV column mask: pair (k, k+1) is a valid w-direction pair only when pixel k
    # is not the last column of an image row. Host-precomputed f32, fetched once.
    wmask = jnp.asarray(
        ((np.arange(hw - 1) % w) != (w - 1)).astype(np.float32).reshape(1, hw - 1))

    def kernel(wm_ref, xe_ref, yc_ref, ic_ref, gen_ref, img_ref, out_ref):
        s = pl.program_id(1)

        @pl.when(s == 0)
        def _init():
            out_ref[...] = jnp.zeros_like(out_ref)

        f32 = jnp.float32
        xe = xe_ref[...].astype(f32)
        yc = yc_ref[...].astype(f32)
        ic = ic_ref[...].astype(f32)
        g = gen_ref[...].astype(f32)
        img = img_ref[...].astype(f32)

        # Raw (unweighted) per-tile sums: elementwise VPU work plus one cross-lane
        # reduce each, hidden under the HBM DMA of the next tile.
        d1 = xe - ic
        d3 = yc - xe
        d2 = img - g
        s1 = jnp.sum(d1 * d1)
        s3 = jnp.sum(d3 * d3)
        s2 = jnp.sum(d2 * d2)

        # Total variation on the flat layout (exact: cross-row pairs masked out).
        dw = img[:, : hw - 1] - img[:, 1:]
        tv = jnp.sum(dw * dw * wm_ref[...])
        if h > 1:
            dh = img[:, : hw - w] - img[:, w:]
            tv = tv + jnp.sum(dh * dh)

        # Weights applied once per grid step (to scalars), not per element.
        out_ref[...] += w_enc * s1 + w_enc_delta * s3 + w_img * s2 + TV_LAMBDA * tv

    big_spec = pl.BlockSpec((block_nc, hw), lambda p, s: (p * steps + s, 0))

    needed = block_nc * _per_row_vmem_bytes(hw, itemsize) + (1 << 20)
    vmem_limit = max(int(vmem_cap * 0.70), needed)
    vmem_limit = int(min(vmem_limit, vmem_cap - (2 << 20)))

    out = pl.pallas_call(
        kernel,
        out_shape=jax.ShapeDtypeStruct((1, 128 * n_par), jnp.float32),
        grid=grid,
        in_specs=[
            pl.BlockSpec((1, hw - 1), lambda p, s: (0, 0)),  # TV mask (fetched once)
            big_spec,   # x_encoded
            big_spec,   # y_convolved
            big_spec,   # i_convolved
            big_spec,   # gen
            big_spec,   # i (image)
        ],
        out_specs=pl.BlockSpec((1, 128), lambda p, s: (0, p)),
        compiler_params=pltpu.CompilerParams(
            dimension_semantics=("parallel", "arbitrary"),
            vmem_limit_bytes=vmem_limit,
        ),
    )(wmask, xe2, yc2, ic2, gen2, img2)

    # Each 128-lane slot holds one shard's partial sum (broadcast across its lanes).
    partials = out.reshape(n_par, 128)[:, 0]
    return jnp.sum(partials)


def alg2_loss_ref(x_encoded, y_convolved, gen, i, i_convolved):
    xe = x_encoded.astype(jnp.float32)
    yc = y_convolved.astype(jnp.float32)
    g = gen.astype(jnp.float32)
    img = i.astype(jnp.float32)
    ic = i_convolved.astype(jnp.float32)
    mse = lambda a, b: jnp.mean((a - b) ** 2)
    w_var = jnp.sum((img[:, :, :, :-1] - img[:, :, :, 1:]) ** 2)
    h_var = jnp.sum((img[:, :, :-1, :] - img[:, :, 1:, :]) ** 2)
    tv = h_var + w_var
    return mse(xe, ic) + TAU * mse(img, g) + DELTA * mse(yc, xe) + TV_LAMBDA * tv


if __name__ == "__main__":
    key = jax.random.PRNGKey(0)
    k1, k2, k3, k4, k5 = jax.random.split(key, 5)

    # N*C = 32, H*W = 256.
    N, C, H, W = 2, 16, 16, 16
    shape = (N, C, H, W)
    x_encoded = jax.random.normal(k1, shape, dtype=jnp.float32)
    y_convolved = jax.random.normal(k2, shape, dtype=jnp.float32)
    gen = jax.random.normal(k3, shape, dtype=jnp.float32)
    img = jax.random.normal(k4, shape, dtype=jnp.float32)
    i_convolved = jax.random.normal(k5, shape, dtype=jnp.float32)

    ref = alg2_loss_ref(x_encoded, y_convolved, gen, img, i_convolved)

    # Forced small tile -> grid (2, 2): exercises the 2-way shard split and the
    # per-shard multi-step accumulator.
    loss_tiled = alg2_loss(x_encoded, y_convolved, gen, img, i_convolved, block_nc=8)
    # Auto (VMEM-budget driven) tile selection.
    loss_auto = alg2_loss(x_encoded, y_convolved, gen, img, i_convolved)
    jax.block_until_ready((loss_tiled, loss_auto))

    for name, val in (("tiled", loss_tiled), ("auto", loss_auto)):
        if not jnp.allclose(val, ref, rtol=1e-4, atol=1e-3):
            raise AssertionError(f"mismatch ({name}): kernel={val} ref={ref}")

    print("KERNEL_OK")
</pallas_src>

<mosaic_0001>
module attributes {stable_mosaic.version = 11 : i64} {
  func.func @kernel(%arg0: i32, %arg1: i32, %arg2: memref<1x255xf32, #tpu.memory_space<vmem>>, %arg3: memref<8x256xf32, #tpu.memory_space<vmem>>, %arg4: memref<8x256xf32, #tpu.memory_space<vmem>>, %arg5: memref<8x256xf32, #tpu.memory_space<vmem>>, %arg6: memref<8x256xf32, #tpu.memory_space<vmem>>, %arg7: memref<8x256xf32, #tpu.memory_space<vmem>>, %arg8: memref<1x128xf32, #tpu.memory_space<vmem>>) attributes {dimension_semantics = [#tpu.dimension_semantics<parallel>, #tpu.dimension_semantics<arbitrary>], iteration_bounds = array<i64: 2, 2>, scalar_prefetch = 0 : i64, scratch_operands = 0 : i64, tpu.core_type = #tpu.core_type<tc>, window_params = [{pipeline_mode = #tpu.pipeline_mode<synchronous>, transform_indices = @transform_0, window_bounds = array<i64: 1, 255>}, {transform_indices = @transform_1, window_bounds = array<i64: 8, 256>}, {transform_indices = @transform_2, window_bounds = array<i64: 8, 256>}, {transform_indices = @transform_3, window_bounds = array<i64: 8, 256>}, {transform_indices = @transform_4, window_bounds = array<i64: 8, 256>}, {transform_indices = @transform_5, window_bounds = array<i64: 8, 256>}, {transform_indices = @transform_6, window_bounds = array<i64: 1, 128>}]} {
    %c0_i32 = arith.constant 0 : i32
    %0 = arith.cmpi eq, %arg1, %c0_i32 : i32
    %1 = arith.extui %0 : i1 to i32
    %c0_i32_0 = arith.constant 0 : i32
    %2 = arith.cmpi ne, %1, %c0_i32_0 : i32
    scf.if %2 {
      %cst_24 = arith.constant 0.000000e+00 : f32
      %57 = vector.broadcast %cst_24 : f32 to vector<1x128xf32>
      %c0_25 = arith.constant 0 : index
      %c0_26 = arith.constant 0 : index
      %58 = vector.load %arg8[%c0_25, %c0_26] : memref<1x128xf32, #tpu.memory_space<vmem>>, vector<1x128xf32>
      tpu.vector_store %arg8[%c0_25, %c0_26], %57 {strides = array<i32>} : memref<1x128xf32, #tpu.memory_space<vmem>>, vector<1x128xf32>,
    } else {
    }
    %c0 = arith.constant 0 : index
    %c0_1 = arith.constant 0 : index
    %3 = vector.load %arg3[%c0, %c0_1] : memref<8x256xf32, #tpu.memory_space<vmem>>, vector<8x256xf32>
    %c0_2 = arith.constant 0 : index
    %c0_3 = arith.constant 0 : index
    %4 = vector.load %arg4[%c0_2, %c0_3] : memref<8x256xf32, #tpu.memory_space<vmem>>, vector<8x256xf32>
    %c0_4 = arith.constant 0 : index
    %c0_5 = arith.constant 0 : index
    %5 = vector.load %arg5[%c0_4, %c0_5] : memref<8x256xf32, #tpu.memory_space<vmem>>, vector<8x256xf32>
    %c0_6 = arith.constant 0 : index
    %c0_7 = arith.constant 0 : index
    %6 = vector.load %arg6[%c0_6, %c0_7] : memref<8x256xf32, #tpu.memory_space<vmem>>, vector<8x256xf32>
    %c0_8 = arith.constant 0 : index
    %c0_9 = arith.constant 0 : index
    %7 = vector.load %arg7[%c0_8, %c0_9] : memref<8x256xf32, #tpu.memory_space<vmem>>, vector<8x256xf32>
    %8 = arith.subf %3, %5 : vector<8x256xf32>
    %9 = arith.subf %4, %3 : vector<8x256xf32>
    %10 = arith.subf %7, %6 : vector<8x256xf32>
    %11 = arith.mulf %8, %8 : vector<8x256xf32>
    %12 = vector.shape_cast %11 : vector<8x256xf32> to vector<1x8x256xf32>
    %cst = arith.constant dense<0.000000e+00> : vector<1xf32>
    %13 = vector.multi_reduction <add>, %12, %cst [1, 2] : vector<1x8x256xf32> to vector<1xf32>
    %14 = vector.shape_cast %13 : vector<1xf32> to vector<1x1x1xf32>
    %15 = vector.extract %14[0, 0, 0] : f32 from vector<1x1x1xf32>
    %16 = arith.mulf %9, %9 : vector<8x256xf32>
    %17 = vector.shape_cast %16 : vector<8x256xf32> to vector<1x8x256xf32>
    %cst_10 = arith.constant dense<0.000000e+00> : vector<1xf32>
    %18 = vector.multi_reduction <add>, %17, %cst_10 [1, 2] : vector<1x8x256xf32> to vector<1xf32>
    %19 = vector.shape_cast %18 : vector<1xf32> to vector<1x1x1xf32>
    %20 = vector.extract %19[0, 0, 0] : f32 from vector<1x1x1xf32>
    %21 = arith.mulf %10, %10 : vector<8x256xf32>
    %22 = vector.shape_cast %21 : vector<8x256xf32> to vector<1x8x256xf32>
    %cst_11 = arith.constant dense<0.000000e+00> : vector<1xf32>
    %23 = vector.multi_reduction <add>, %22, %cst_11 [1, 2] : vector<1x8x256xf32> to vector<1xf32>
    %24 = vector.shape_cast %23 : vector<1xf32> to vector<1x1x1xf32>
    %25 = vector.extract %24[0, 0, 0] : f32 from vector<1x1x1xf32>
    %26 = vector.extract_strided_slice %7 {offsets = [0, 0], sizes = [8, 255], strides = [1, 1]} : vector<8x256xf32> to vector<8x255xf32>
    %27 = vector.extract_strided_slice %7 {offsets = [0, 1], sizes = [8, 255], strides = [1, 1]} : vector<8x256xf32> to vector<8x255xf32>
    %28 = arith.subf %26, %27 : vector<8x255xf32>
    %29 = arith.mulf %28, %28 : vector<8x255xf32>
    %c0_12 = arith.constant 0 : index
    %c0_13 = arith.constant 0 : index
    %30 = vector.load %arg2[%c0_12, %c0_13] : memref<1x255xf32, #tpu.memory_space<vmem>>, vector<1x255xf32>
    %31 = vector.broadcast %30 : vector<1x255xf32> to vector<8x255xf32>
    %32 = arith.mulf %29, %31 : vector<8x255xf32>
    %33 = vector.shape_cast %32 : vector<8x255xf32> to vector<1x8x255xf32>
    %cst_14 = arith.constant dense<0.000000e+00> : vector<1xf32>
    %34 = vector.multi_reduction <add>, %33, %cst_14 [1, 2] : vector<1x8x255xf32> to vector<1xf32>
    %35 = vector.shape_cast %34 : vector<1xf32> to vector<1x1x1xf32>
    %36 = vector.extract %35[0, 0, 0] : f32 from vector<1x1x1xf32>
    %37 = vector.extract_strided_slice %7 {offsets = [0, 0], sizes = [8, 240], strides = [1, 1]} : vector<8x256xf32> to vector<8x240xf32>
    %38 = vector.extract_strided_slice %7 {offsets = [0, 16], sizes = [8, 240], strides = [1, 1]} : vector<8x256xf32> to vector<8x240xf32>
    %39 = arith.subf %37, %38 : vector<8x240xf32>
    %40 = arith.mulf %39, %39 : vector<8x240xf32>
    %41 = vector.shape_cast %40 : vector<8x240xf32> to vector<1x8x240xf32>
    %cst_15 = arith.constant dense<0.000000e+00> : vector<1xf32>
    %42 = vector.multi_reduction <add>, %41, %cst_15 [1, 2] : vector<1x8x240xf32> to vector<1xf32>
    %43 = vector.shape_cast %42 : vector<1xf32> to vector<1x1x1xf32>
    %44 = vector.extract %43[0, 0, 0] : f32 from vector<1x1x1xf32>
    %45 = arith.addf %36, %44 : f32
    %c0_16 = arith.constant 0 : index
    %c0_17 = arith.constant 0 : index
    %46 = vector.load %arg8[%c0_16, %c0_17] : memref<1x128xf32, #tpu.memory_space<vmem>>, vector<1x128xf32>
    %cst_18 = arith.constant 1.22070313E-4 : f32
    %47 = arith.mulf %cst_18, %15 : f32
    %cst_19 = arith.constant 0.0122070313 : f32
    %48 = arith.mulf %cst_19, %20 : f32
    %49 = arith.addf %47, %48 : f32
    %cst_20 = arith.constant 6.10351563E-5 : f32
    %50 = arith.mulf %cst_20, %25 : f32
    %51 = arith.addf %49, %50 : f32
    %cst_21 = arith.constant 1.000000e-03 : f32
    %52 = arith.mulf %cst_21, %45 : f32
    %53 = arith.addf %51, %52 : f32
    %54 = vector.broadcast %53 : f32 to vector<1x128xf32>
    %55 = arith.addf %46, %54 : vector<1x128xf32>
    %c0_22 = arith.constant 0 : index
    %c0_23 = arith.constant 0 : index
    %56 = vector.load %arg8[%c0_22, %c0_23] : memref<1x128xf32, #tpu.memory_space<vmem>>, vector<1x128xf32>
    tpu.vector_store %arg8[%c0_22, %c0_23], %55 {strides = array<i32>} : memref<1x128xf32, #tpu.memory_space<vmem>>, vector<1x128xf32>,
    return
  }
  func.func @transform_0(%arg0: i32, %arg1: i32) -> (i32, i32) {
    %c0_i32 = arith.constant 0 : i32
    %c0_i32_0 = arith.constant 0 : i32
    %c0_i32_1 = arith.constant 0 : i32
    return %c0_i32, %c0_i32_0 : i32, i32
  }
  func.func @transform_1(%arg0: i32, %arg1: i32) -> (i32, i32) {
    %c2_i32 = arith.constant 2 : i32
    %0 = arith.muli %arg0, %c2_i32 : i32
    %1 = arith.addi %0, %arg1 : i32
    %c0_i32 = arith.constant 0 : i32
    %c0_i32_0 = arith.constant 0 : i32
    return %1, %c0_i32 : i32, i32
  }
  func.func @transform_2(%arg0: i32, %arg1: i32) -> (i32, i32) {
    %c2_i32 = arith.constant 2 : i32
    %0 = arith.muli %arg0, %c2_i32 : i32
    %1 = arith.addi %0, %arg1 : i32
    %c0_i32 = arith.constant 0 : i32
    %c0_i32_0 = arith.constant 0 : i32
    return %1, %c0_i32 : i32, i32
  }
  func.func @transform_3(%arg0: i32, %arg1: i32) -> (i32, i32) {
    %c2_i32 = arith.constant 2 : i32
    %0 = arith.muli %arg0, %c2_i32 : i32
    %1 = arith.addi %0, %arg1 : i32
    %c0_i32 = arith.constant 0 : i32
    %c0_i32_0 = arith.constant 0 : i32
    return %1, %c0_i32 : i32, i32
  }
  func.func @transform_4(%arg0: i32, %arg1: i32) -> (i32, i32) {
    %c2_i32 = arith.constant 2 : i32
    %0 = arith.muli %arg0, %c2_i32 : i32
    %1 = arith.addi %0, %arg1 : i32
    %c0_i32 = arith.constant 0 : i32
    %c0_i32_0 = arith.constant 0 : i32
    return %1, %c0_i32 : i32, i32
  }
  func.func @transform_5(%arg0: i32, %arg1: i32) -> (i32, i32) {
    %c2_i32 = arith.constant 2 : i32
    %0 = arith.muli %arg0, %c2_i32 : i32
    %1 = arith.addi %0, %arg1 : i32
    %c0_i32 = arith.constant 0 : i32
    %c0_i32_0 = arith.constant 0 : i32
    return %1, %c0_i32 : i32, i32
  }
  func.func @transform_6(%arg0: i32, %arg1: i32) -> (i32, i32) {
    %c0_i32 = arith.constant 0 : i32
    %c0_i32_0 = arith.constant 0 : i32
    return %c0_i32, %arg0 : i32, i32
  }
}

</mosaic_0001>

<bundles_post_ra>
// kernel: tpu_custom_call.1
= control target key start
LH: loop header
LB: loop body
LE: loop exit
PB: predicated region body
PF: predicated region fallthrough
CT: control target
= control target key end

     0   :  { %s1791_s0 = inlined_call_operand.hbm [shape: f32[1,255], index: 0, kind: input, shape index: {}]   ;;  %s1792_s1 = inlined_call_operand.hbm [shape: f32[32,256], index: 1, kind: input, shape index: {}]   ;;  %s1793_s2 = inlined_call_operand.hbm [shape: f32[32,256], index: 2, kind: input, shape index: {}]   ;;  %s1794_s3 = inlined_call_operand.hbm [shape: f32[32,256], index: 3, kind: input, shape index: {}]   ;;  %s1795_s4 = inlined_call_operand.hbm [shape: f32[32,256], index: 4, kind: input, shape index: {}]   ;;  %s1796_s5 = inlined_call_operand.hbm [shape: f32[32,256], index: 5, kind: input, shape index: {}]   ;;  %s1797_s6 = inlined_call_operand.hbm [shape: f32[1,256], index: 6, kind: output, shape index: {}]  }
   0x1   :  { %1816 = sst [smem:[#allocation30_spill]] %s1792_s1 }
   0x2   :  { %1817 = sst [smem:[#allocation31_spill]] %s1793_s2 }
   0x3   :  { %1818 = sst [smem:[#allocation32_spill]] %s1794_s3 }
   0x4   :  { %1819 = sst [smem:[#allocation33_spill]] %s1797_s6 }
   0x5   :  { %11 = vsyncpa [#allocation3], 0 }
   0x6   :  { %12 = vsyncpa [#allocation6], 0 }
   0x7   :  { %14 = vsyncpa [#allocation6 + $0x1], 0 }
   0x8   :  { %15 = vsyncpa [#allocation9], 0 }
   0x9   :  { %17 = vsyncpa [#allocation9 + $0x1], 0 }
   0xa   :  { %18 = vsyncpa [#allocation12], 0 }
   0xb   :  { %20 = vsyncpa [#allocation12 + $0x1], 0 }
   0xc   :  { %21 = vsyncpa [#allocation4], 0 }
   0xd   :  { %23 = vsyncpa [#allocation4 + $0x1], 0  ;;  %s1363_s21 = smov 0   ;;  %s1365_s22 = smov 0  }
   0xe   :  { %s1367_s23 = smov 0   ;;  %s1369_s24 = smov 0  }
   0xf   :  { %s1371_s25 = smov 0   ;;  %s1373_s26 = smov 0  }
  0x10   :  { %s1375_s27 = smov 0   ;;  %s1377_s28 = smov 0  }
  0x11   :  { %s1379_s29 = smov 0   ;;  %s1381_s30 = smov 0  }
  0x12   :  { %s1383_s7 = smov 0  }
  0x13 LB: > { %1820 = sst [smem:[#allocation19_spill]] %s1276_s21  ;;  %s38_s8 = sadd.s32 1, %s1308_s29  ;;  %s1316_s7 = sphi %s1383_s7, %s29_s7   ;;  %s1312_s30 = sphi %s1381_s30, %s1871_s30   ;;  %s1308_s29 = sphi %s1379_s29, %s1870_s29   ;;  %s1304_s28 = sphi %s1377_s28, %s1869_s28   ;;  %s1300_s27 = sphi %s1375_s27, %s1877_s27   ;;  %s1296_s26 = sphi %s1373_s26, %s1876_s26   ;;  %s1292_s25 = sphi %s1371_s25, %s1875_s25   ;;  %s1288_s24 = sphi %s1369_s24, %s1874_s24   ;;  %s1284_s23 = sphi %s1367_s23, %s1866_s23   ;;  %s1280_s22 = sphi %s1365_s22, %s1873_s22   ;;  %s1276_s21 = sphi %s1363_s21, %s1872_s21  }
  0x14   : > { %1821 = sst [smem:[#allocation20_spill]] %s1284_s23  ;;  %s41_s9 = sadd.s32 1, %s1312_s30 }
  0x15   : > { %1822 = sst [smem:[#allocation21_spill]] %s1300_s27  ;;  %p39_p0 = scmp.ge.s32.totalorder %s38_s8, 2 }
  0x16   : > { %1823 = sst [smem:[#allocation22_spill]] %s1304_s28  ;;  %s809_s10 = sshll.u32 %s1312_s30, 1 }
  0x17   : > { %1824 = sst [smem:[#allocation23_spill]] %s1308_s29  ;;  %s67_s11 = sadd.s32 %s1308_s29, %s809_s10 }
  0x18   : > { %1825 = sst [smem:[#allocation24_spill]] %s1312_s30  ;;  %s73_s12 = sadd.s32 1, %s1296_s26 }
  0x19   : > { %s1879_s8 = smov (%p39_p0, %s38_s8), 0  ;;  %s1881_s9 = smov (!%p39_p0, %s41_s9), %s1312_s30 }
  0x1a   : > { %1826 = sst [smem:[#allocation25_spill]] %s1879_s8  ;;  %p80_p1 = scmp.ne.s32.totalorder %s1296_s26, %s1292_s25 }
  0x1b   : > { %p81_p2 = scmp.eq.s32.totalorder %s1316_s7, 0  ;;  %p43_p3 = scmp.ge.s32.totalorder %s1881_s9, 2 }
  0x1c   : > { %p909_p5 = scmp.lt.s32.totalorder %s1316_s7, 4  ;;  %s1800_s15 = sand.u32 1, %s1296_s26  }
  0x1d   : > { %p1429_p4 = por %p81_p2, %p80_p1  ;;  %s1883_s9 = smov (%p43_p3, %s1881_s9), 0 }
  0x1e   : > { %1828 = sst [smem:[#allocation26_spill]] %s1883_s9  ;;  %s810_s16 = sshll.u32 %s1883_s9, 1 }
  0x1f   : > { %s216_s17 = ssub.s32 %s1312_s30, %s1883_s9  ;;  %s69_s18 = sadd.s32 %s810_s16, %s1879_s8 }
  0x20   : > { %p1442_p6 = scmp.eq.s32.totalorder %s216_s17, 0  ;;  %s70_s20 = ssub.s32 %s67_s11, %s69_s18 }
  0x21   : > { %p71_p7 = scmp.eq.s32.totalorder %s70_s20, 0  ;;  %s1448_s10 = sshll.u32 %s1800_s15, 4 }
  0x22   : > { %s1829_s19 = scalar_select %p1442_p6, 1, 0 }
  0x23   : > { %s1450_s29 = sshll.u32 %s67_s11, 8  ;;  %s1831_s1 = sld [smem:[#allocation30_spill]] }
  0x24   : > { %s1453_s14 = scalar_select %p71_p7, %s1296_s26, %s73_s12  }
  0x25   : > { %s271_s17 = scalar_lea.vmem [#allocation5], %s1448_s10  ;;  %p1468_p8 = pnand %p909_p5, %p1429_p4 }
  0x26   : > { %1830 = sst [smem:[#allocation27_spill]] %s1453_s14  ;;  %s281_s18 = sshll.u32 %s271_s17, 4  ;;  %s1462_s18 = int_to_ptr.vmem [resolvable:$true] %s281_s18 }
  0x27   : > { %s1832_s11 = scalar_select %p1468_p8, 1, 0 }
  0x28   : > { %s1833_s3 = sld [smem:[#allocation32_spill]]  ;;  %s1834_s28 = sand.u32 1, %s1316_s7  }
  0x29   : > { %s1459_s16 = scalar_lea.hbm %s1831_s1, %s1450_s29  ;;  %s1480_s15 = scalar_lea.sflag [#allocation6], %s1834_s28 }
  0x2a   : > { %s1004_s9 = scalar_lea.hbm %s1459_s16, 256  ;;  %p1486_p10 = pneg %p1468_p8 }
  0x2b   : > { %p1005_p9 = scmp.ne.s32.totalorder %s1459_s16, %s1004_s9  ;;  %s1009_s12 = scalar_lea.hbm %s1831_s1, 1024 }
  0x2c   : > { %s1835_s17 = scalar_select %p1486_p10, 1, 0 }
  0x2d   : > { %p1007_p11 = pnand %p1486_p10, %p1005_p9  ;;  %p1010_p13 = scmp.lt.u32.totalorder %s1459_s16, %s1831_s1 }
  0x2e   : > { %s1476_s6 = scalar_lea.hbm %s1833_s3, %s1450_s29  ;;  %p1011_p0 = scmp.lt.u32.totalorder %s1009_s12, %s1004_s9 }
  0x2f   : > { %p1008_p12 = pneg %p1007_p11  ;;  %p1013_p2 = scmp.lt.u32.totalorder %s1004_s9, %s1459_s16 }
  0x30   : > { %p1012_p1 = por %p1011_p0, %p1010_p13 }
  0x32   : > { %p1014_p3 = por %p1013_p2, %p1012_p1 }
  0x34   : > { %p1015_p4 = pnand %p1014_p3, %p1008_p12 }
  0x36   : > { %1018 = shalt.err (!%p1015_p4)
}
  0x37   : > { %s1019_s28 = scalar_lea.vmem %s1462_s18, 256  ;;  %s1318_s8 = smov [#allocation5]  }
  0x38   : > { %p1020_p5 = scmp.ne.s32.totalorder %s1462_s18, %s1019_s28  ;;  %s1024_s13 = sshll.u32 %s1318_s8, 4  ;;  %s1025_s13 = int_to_ptr.vmem [resolvable:$false] %s1024_s13 }
  0x39   : > { %s1026_s30 = scalar_lea.vmem %s1025_s13, 512  ;;  %p1027_p11 = scmp.lt.s32.totalorder %s1462_s18, %s1025_s13 }
  0x3a   : > { %p1022_p7 = pnand %p1020_p5, %p1486_p10  ;;  %p1028_p6 = scmp.lt.s32.totalorder %s1026_s30, %s1019_s28 }
  0x3c   : > { %p1023_p9 = pneg %p1022_p7  ;;  %p1029_p13 = por %p1028_p6, %p1027_p11 }
  0x3e   : > { %p1030_p0 = pnand %p1029_p13, %p1023_p9 }
  0x40   : > { %1033 = shalt.err (!%p1030_p0)
}
  0x41   : > { %891 = dma.hbm_to_vmem [thread:$0]  (!%p1468_p8), %s1459_s16, 256, %s1462_s18, %s1480_s15  }
  0x42   : > { %s313_s9 = scalar_lea.vmem [#allocation8], %s1448_s10  ;;  %s1836_s20 = sand.u32 1, %s1316_s7  }
  0x43   : > { %s323_s12 = sshll.u32 %s313_s9, 4  ;;  %s1513_s28 = scalar_lea.sflag [#allocation9], %s1836_s20  ;;  %s324_s12 = int_to_ptr.vmem [resolvable:$true] %s323_s12 }
  0x44   : > { %s1034_s8 = scalar_lea.hbm %s1476_s6, 256  ;;  %s1039_s1 = scalar_lea.hbm %s1833_s3, 1024 }
  0x45   : > { %p1035_p6 = scmp.ne.s32.totalorder %s1476_s6, %s1034_s8  ;;  %p1040_p2 = scmp.lt.u32.totalorder %s1476_s6, %s1833_s3 }
  0x46   : > { %p1041_p3 = scmp.lt.u32.totalorder %s1039_s1, %s1034_s8  ;;  %p1043_p5 = scmp.lt.u32.totalorder %s1034_s8, %s1476_s6 }
  0x47   : > { %p1037_p12 = pnand %p1035_p6, %p1486_p10 }
  0x48   : > { %p1042_p4 = por %p1041_p3, %p1040_p2 }
  0x49   : > { %p1038_p1 = pneg %p1037_p12 }
  0x4a   : > { %p1044_p7 = por %p1043_p5, %p1042_p4 }
  0x4c   : > { %p1045_p9 = pnand %p1044_p7, %p1038_p1 }
  0x4e   : > { %1048 = shalt.err (!%p1045_p9)
}
  0x4f   : > { %s1049_s16 = scalar_lea.vmem %s324_s12, 256  ;;  %s1319_s18 = smov [#allocation8]  }
  0x50   : > { %p1050_p11 = scmp.ne.s32.totalorder %s324_s12, %s1049_s16  ;;  %s1054_s9 = sshll.u32 %s1319_s18, 4  ;;  %s1055_s9 = int_to_ptr.vmem [resolvable:$false] %s1054_s9 }
  0x51   : > { %s1056_s20 = scalar_lea.vmem %s1055_s9, 512  ;;  %p1057_p6 = scmp.lt.s32.totalorder %s324_s12, %s1055_s9 }
  0x52   : > { %p1052_p13 = pnand %p1050_p11, %p1486_p10  ;;  %p1058_p12 = scmp.lt.s32.totalorder %s1056_s20, %s1049_s16 }
  0x54   : > { %p1053_p0 = pneg %p1052_p13  ;;  %p1059_p8 = por %p1058_p12, %p1057_p6 }
  0x56   : > { %p1060_p2 = pnand %p1059_p8, %p1053_p0 }
  0x58   : > { %1063 = shalt.err (!%p1060_p2)
}
  0x59   : > { %p1837_p3 = scmp.ne.s32.totalorder %s1832_s11, 0  ;;  %s1534_s1 = sadd.s32 4294967295, %s1316_s7  }
  0x5a   : > { %s808_s27 = sadd.s32 4294967294, %s1316_s7   ;;  %p86_p8 = scmp.ne.s32.totalorder %s1292_s25, %s1288_s24 }
  0x5b   : > { %897 = dma.hbm_to_vmem [thread:$0]  (!%p1837_p3), %s1476_s6, 256, %s324_s12, %s1513_s28  }
  0x5c   : > { %p1807_p1 = scmp.eq.s32.totalorder %s1534_s1, 0  ;;  %s219_s14 = sadd.s32 1, %s1284_s23 }
  0x5d   : > { %p229_p4 = scmp.ne.s32.totalorder %s1284_s23, %s1280_s22  ;;  %p230_p7 = scmp.eq.s32.totalorder %s1534_s1, 3 }
  0x5e   : > { %p1545_p5 = por %p1807_p1, %p86_p8  ;;  %p1839_p9 = scmp.ne.s32.totalorder %s1829_s19, 0 }
  0x5f   : > { %p1555_p11 = por %p230_p7, %p229_p4  ;;  %p235_p13 = scmp.ne.s32.totalorder %s1280_s22, %s1276_s21 }
  0x60   : > { %s1838_s8 = scalar_select %p1545_p5, 1, 0 }
  0x61   : > { %s1553_s6 = scalar_select %p1839_p9, %s1284_s23, %s219_s14  }
  0x62   : > { %s1841_s12 = scalar_select %p1555_p11, 1, 0 }
  0x63   : > { %1840 = sst [smem:[#allocation28_spill]] %s1553_s6  ;;  %p236_p0 = scmp.eq.s32.totalorder %s808_s27, 3 }
  0x64   : > { %p819_p6 = scmp.ge.s32.totalorder %s1316_s7, 1  ;;  %p243_p12 = scmp.lt.s32.totalorder %s1316_s7, 5 }
  0x65   : > { %p1563_p2 = por %p236_p0, %p235_p13  ;;  %s1320_s19 = smov [#allocation2]  }
  0x66   : > { %p1567_p8 = pnand %p819_p6, %p243_p12  ;;  %s256_s30 = sshll.u32 %s1320_s19, 4  ;;  %s1571_s30 = int_to_ptr.vmem [resolvable:$true] %s256_s30 }
  0x67   : > { %s1842_s24 = scalar_select %p1563_p2, 1, 0 }
  0x68   : > { %s1844_s13 = scalar_select %p1567_p8, 1, 0 }
  0x69   : > { %1843 = sst [smem:[#allocation29_spill]] %s1842_s24  ;;  %p884_p4 = pneg %p1567_p8 }
  0x6a   : > { %s1845_s2 = sld [smem:[#allocation31_spill]]  ;;  %s292_s20 = scalar_lea.vmem [#allocation7], %s1448_s10 }
  0x6b   : > { %s302_s27 = sshll.u32 %s292_s20, 4  ;;  %p1584_p7 = pnand %p884_p4, %p1807_p1  ;;  %s303_s27 = int_to_ptr.vmem [resolvable:$true] %s302_s27 }
  0x6d   : > { %s1846_s14 = scalar_select %p1584_p7, 1, 0 }
  0x70   : > { %s1579_s9 = scalar_lea.hbm %s1845_s2, %s1450_s29  ;;  %s1069_s3 = scalar_lea.hbm %s1845_s2, 1024 }
  0x71   : > { %s1064_s19 = scalar_lea.hbm %s1579_s9, 256  ;;  %p1070_p6 = scmp.lt.u32.totalorder %s1579_s9, %s1845_s2 }
  0x72   : > { %p1065_p9 = scmp.ne.s32.totalorder %s1579_s9, %s1064_s19  ;;  %p1071_p12 = scmp.lt.u32.totalorder %s1069_s3, %s1064_s19 }
  0x73   : > { %p1073_p4 = scmp.lt.u32.totalorder %s1064_s19, %s1579_s9 }
  0x74   : > { %p1067_p13 = pnand %p1065_p9, %p1486_p10  ;;  %p1072_p2 = por %p1071_p12, %p1070_p6 }
  0x76   : > { %p1068_p0 = pneg %p1067_p13  ;;  %p1074_p1 = por %p1073_p4, %p1072_p2 }
  0x78   : > { %p1075_p11 = pnand %p1074_p1, %p1068_p0 }
  0x7a   : > { %1078 = shalt.err (!%p1075_p11)
}
  0x7b   : > { %s1079_s20 = scalar_lea.vmem %s303_s27, 256  ;;  %s1321_s24 = smov [#allocation7]  }
  0x7c   : > { %p1080_p5 = scmp.ne.s32.totalorder %s303_s27, %s1079_s20  ;;  %s1084_s21 = sshll.u32 %s1321_s24, 4  ;;  %s1085_s21 = int_to_ptr.vmem [resolvable:$false] %s1084_s21 }
  0x7d   : > { %s1086_s16 = scalar_lea.vmem %s1085_s21, 512  ;;  %p1087_p8 = scmp.lt.s32.totalorder %s303_s27, %s1085_s21 }
  0x7e   : > { %p1082_p9 = pnand %p1080_p5, %p1486_p10  ;;  %p1088_p7 = scmp.lt.s32.totalorder %s1086_s16, %s1079_s20 }
  0x80   : > { %p1083_p13 = pneg %p1082_p9  ;;  %p1089_p3 = por %p1088_p7, %p1087_p8 }
  0x82   : > { %p1090_p6 = pnand %p1089_p3, %p1083_p13 }
  0x84   : > { %1093 = shalt.err (!%p1090_p6)
}
  0x85   : > { %p1847_p12 = scmp.ne.s32.totalorder %s1832_s11, 0  ;;  %s1610_s6 = scalar_lea.hbm %s1795_s4, %s1450_s29 }
  0x86   : > { %s1094_s21 = scalar_lea.hbm %s1791_s0, 32  ;;  %p1848_p1 = scmp.ne.s32.totalorder %s1846_s14, 0 }
  0x87   : > { %894 = dma.hbm_to_vmem [thread:$0]  (!%p1847_p12), %s1579_s9, 256, %s303_s27, %s1480_s15  }
  0x88   : > { %p1095_p3 = scmp.ne.s32.totalorder %s1791_s0, %s1094_s21  ;;  %p1096_p5 = pneg %p1848_p1 }
  0x89   : > { %p1101_p8 = scmp.lt.u32.totalorder %s1094_s21, %s1791_s0 }
  0x8a   : > { %p1097_p11 = pnand %p1096_p5, %p1095_p3 }
  0x8c   : > { %p1098_p2 = pneg %p1097_p11 }
  0x8e   : > { %p1103_p7 = pnand %p1101_p8, %p1098_p2 }
  0x90   : > { %1106 = shalt.err (!%p1103_p7)
}
  0x91   : > { %s1107_s15 = scalar_lea.vmem %s1571_s30, 32  ;;  %p1115_p13 = scmp.lt.s32.totalorder %s1571_s30, %s1571_s30 }
  0x92   : > { %p1108_p0 = scmp.ne.s32.totalorder %s1571_s30, %s1107_s15  ;;  %p1116_p6 = scmp.lt.s32.totalorder %s1107_s15, %s1107_s15 }
  0x94   : > { %p1110_p4 = pnand %p1108_p0, %p1096_p5  ;;  %p1117_p12 = por %p1116_p6, %p1115_p13 }
  0x96   : > { %p1111_p9 = pneg %p1110_p4 }
  0x98   : > { %p1118_p10 = pnand %p1117_p12, %p1111_p9 }
  0x9a   : > { %1121 = shalt.err (!%p1118_p10)
}
  0x9b   : > { %887 = dma.hbm_to_vmem [thread:$0]  (!%p1848_p1), %s1791_s0, 32, %s1571_s30, [#allocation3]  }
  0x9c   : > { %s334_s27 = scalar_lea.vmem [#allocation10], %s1448_s10  ;;  %s1122_s23 = scalar_lea.hbm %s1610_s6, 256 }
  0x9d   : > { %s344_s3 = sshll.u32 %s334_s27, 4  ;;  %p1123_p3 = scmp.ne.s32.totalorder %s1610_s6, %s1122_s23  ;;  %s345_s3 = int_to_ptr.vmem [resolvable:$true] %s344_s3 }
  0x9e   : > { %p1849_p12 = scmp.ne.s32.totalorder %s1835_s17, 0  ;;  %s1127_s19 = scalar_lea.hbm %s1795_s4, 1024 }
  0x9f   : > { %p1128_p11 = scmp.lt.u32.totalorder %s1610_s6, %s1795_s4  ;;  %p1129_p2 = scmp.lt.u32.totalorder %s1127_s19, %s1122_s23 }
  0xa0   : > { %p1125_p10 = pnand %p1123_p3, %p1849_p12  ;;  %p1131_p7 = scmp.lt.u32.totalorder %s1122_s23, %s1610_s6 }
  0xa1   : > { %p1130_p8 = por %p1129_p2, %p1128_p11 }
  0xa2   : > { %p1126_p5 = pneg %p1125_p10 }
  0xa3   : > { %p1132_p1 = por %p1131_p7, %p1130_p8 }
  0xa5   : > { %p1133_p0 = pnand %p1132_p1, %p1126_p5 }
  0xa7   : > { %1136 = shalt.err (!%p1133_p0)
}
  0xa8   : > { %s1137_s30 = scalar_lea.vmem %s345_s3, 256  ;;  %s1322_s20 = smov [#allocation10]  }
  0xa9   : > { %p1138_p4 = scmp.ne.s32.totalorder %s345_s3, %s1137_s30  ;;  %s1142_s16 = sshll.u32 %s1322_s20, 4  ;;  %s1143_s16 = int_to_ptr.vmem [resolvable:$false] %s1142_s16 }
  0xaa   : > { %s1144_s15 = scalar_lea.vmem %s1143_s16, 512  ;;  %p1145_p6 = scmp.lt.s32.totalorder %s345_s3, %s1143_s16 }
  0xab   : > { %p1140_p9 = pnand %p1138_p4, %p1849_p12  ;;  %p1146_p3 = scmp.lt.s32.totalorder %s1144_s15, %s1137_s30 }
  0xad   : > { %p1141_p13 = pneg %p1140_p9  ;;  %p1147_p10 = por %p1146_p3, %p1145_p6 }
  0xaf   : > { %p1148_p2 = pnand %p1147_p10, %p1141_p13 }
  0xb1   : > { %1151 = shalt.err (!%p1148_p2)
}
  0xb2   : > { %p1850_p11 = scmp.ne.s32.totalorder %s1832_s11, 0  ;;  %s1656_s27 = scalar_lea.hbm %s1796_s5, %s1450_s29 }
  0xb3   : > { %s355_s23 = scalar_lea.vmem [#allocation11], %s1448_s10  ;;  %s1851_s24 = sand.u32 1, %s1296_s26  }
  0xb4   : > { %900 = dma.hbm_to_vmem [thread:$0]  (!%p1850_p11), %s1610_s6, 256, %s345_s3, %s1513_s28  }
  0xb5   : > { %s365_s14 = sshll.u32 %s355_s23, 4  ;;  %s352_s19 = scalar_lea.sflag [#allocation12], %s1851_s24  ;;  %s366_s14 = int_to_ptr.vmem [resolvable:$true] %s365_s14 }
  0xb6   : > { %s1152_s21 = scalar_lea.hbm %s1656_s27, 256  ;;  %s1157_s3 = scalar_lea.hbm %s1796_s5, 1024 }
  0xb7   : > { %p1153_p5 = scmp.ne.s32.totalorder %s1656_s27, %s1152_s21  ;;  %p1158_p1 = scmp.lt.u32.totalorder %s1656_s27, %s1796_s5 }
  0xb8   : > { %p1159_p0 = scmp.lt.u32.totalorder %s1157_s3, %s1152_s21  ;;  %p1161_p9 = scmp.lt.u32.totalorder %s1152_s21, %s1656_s27 }
  0xb9   : > { %p1155_p8 = pnand %p1153_p5, %p1849_p12 }
  0xba   : > { %p1160_p4 = por %p1159_p0, %p1158_p1 }
  0xbb   : > { %p1156_p7 = pneg %p1155_p8 }
  0xbc   : > { %p1162_p13 = por %p1161_p9, %p1160_p4 }
  0xbe   : > { %p1163_p6 = pnand %p1162_p13, %p1156_p7 }
  0xc0   : > { %1166 = shalt.err (!%p1163_p6)
}
  0xc1   : > { %s1167_s10 = scalar_lea.vmem %s366_s14, 256  ;;  %s1323_s30 = smov [#allocation11]  }
  0xc2   : > { %p1168_p3 = scmp.ne.s32.totalorder %s366_s14, %s1167_s10  ;;  %s1172_s20 = sshll.u32 %s1323_s30, 4  ;;  %s1173_s20 = int_to_ptr.vmem [resolvable:$false] %s1172_s20 }
  0xc3   : > { %s1174_s16 = scalar_lea.vmem %s1173_s20, 512  ;;  %p1175_p5 = scmp.lt.s32.totalorder %s366_s14, %s1173_s20 }
  0xc4   : > { %p1170_p10 = pnand %p1168_p3, %p1849_p12  ;;  %p1176_p8 = scmp.lt.s32.totalorder %s1174_s16, %s1167_s10 }
  0xc6   : > { %p1171_p2 = pneg %p1170_p10  ;;  %p1177_p11 = por %p1176_p8, %p1175_p5 }
  0xc8   : > { %p1178_p0 = pnand %p1177_p11, %p1171_p2 }
  0xca   : > { %1181 = shalt.err (!%p1178_p0)
}
  0xcb   : > { %p1852_p1 = scmp.ne.s32.totalorder %s1832_s11, 0  ;;  %p1853_p7 = scmp.ne.s32.totalorder %s1844_s13, 0 }
  0xcc   : > { %p1854_p4 = scmp.eq.s32.totalorder (!%p1853_p7), %s1534_s1, 0 }
  0xcd   : > { %903 = dma.hbm_to_vmem [thread:$0]  (!%p1852_p1), %s1656_s27, 256, %s366_s14, %s352_s19  }
  0xce   : > { %374 = sbr.rel (%p1853_p7) target bundleno = 597 (0x255), region = 44 }
  0xd5   : > { %1255 = dma.done.wait (%p1854_p4), [#allocation3], 32   ;;  %p1855_p12 = pmov %p1854_p4 }
  0xd6   : > { %s380_s17 = sand.u32 1, %s1534_s1   ;;  %s382_s15 = sand.u32 1, %s1292_s25  }
  0xd7   : > { %1257 = vsyncadd (%p1855_p12), [#allocation3], 4294967264  ;;  %s1686_s2 = sshll.u32 %s382_s15, 4  ;;  %s381_s11 = scalar_lea.sflag [#allocation6], %s380_s17 }
  0xd8   : > { %s384_s9 = scalar_lea.vmem [#allocation5], %s1686_s2  ;;  %p1856_p11 = scmp.ne.s32.totalorder %s1838_s8, 0 }
  0xda   : > { %1259 = dma.done.wait (%p1856_p11), %s381_s11, 512  }
  0xdb   : > { %1261 = vsyncadd (%p1856_p11), %s381_s11, 4294966784  ;;  %s393_s13 = scalar_lea.vmem [#allocation7], %s1686_s2  ;;  %s399_s27 = scalar_lea.sflag [#allocation9], %s380_s17 }
  0xdc   : > { %s402_s23 = scalar_lea.vmem [#allocation8], %s1686_s2 }
  0xdd   : > { %1263 = dma.done.wait (%p1856_p11), %s399_s27, 512  }
  0xde   : > { %1265 = vsyncadd (%p1856_p11), %s399_s27, 4294966784  ;;  %s411_s1 = scalar_lea.vmem [#allocation10], %s1686_s2  ;;  %s417_s14 = scalar_lea.sflag [#allocation12], %s382_s15 }
  0xdf   : > { %s420_s24 = scalar_lea.vmem [#allocation11], %s1686_s2 }
  0xe0   : > { %1267 = dma.done.wait (%p1856_p11), %s417_s14, 256  }
  0xe1   : > { %1269 = vsyncadd (%p1856_p11), %s417_s14, 4294967040  ;;  %s466_s19 = sand.u32 1, %s1280_s22   ;;  %s1857_s28 = sld [smem:[#allocation21_spill]] }
  0xe2   : > { %s1708_s21 = scalar_lea.vmem [#allocation13], %s466_s19 }
  0xe7   : > { %p849_p9 = scmp.ne.s32.totalorder %s1857_s28, 0 }
  0xe8   : > { %v1324_v0 = vmov (!%p849_p9), 0.0  }
  0xe9   : > { %481 = sbr.rel (%p849_p9) target bundleno = 240 (0xf0), region = 72  ;;  %482 = vst [vmem:[%s1708_s21] sm:$0x1] (!%p849_p9), %v1324_v0 }
  0xf0 PF: > { %v491_v1 = vld [vmem:[%s420_s24] sm:$0xff]  ;;  %s1325_s6 = smov 112   ;;  %s1326_s8 = smov 127   ;;  %v492_v2 = vld [vmem:[%s420_s24 + $0x8] sm:$0xff]  ;;  %v551_v26 = vlaneseq  ;;  %vm578_vm0 = vcmask 916480   ;;  %vm541_vm1 = vcmask 1039360  }
  0xf1   : > { %574 = vrot.lane.b32.xlu1 %v491_v1, %s1325_s6  ;;  %537 = vrot.lane.b32.xlu0 %v491_v1, %s1326_s8  ;;  %v483_v3 = vld [vmem:[%s384_s9] sm:$0xff]  ;;  %v484_v4 = vld [vmem:[%s384_s9 + $0x8] sm:$0xff]  ;;  %s1858_s3 = sld [smem:[#allocation22_spill]]  ;;  %s1859_s28 = sld [smem:[#allocation33_spill]] }
  0xf2   : > { %v487_v5 = vld [vmem:[%s402_s23] sm:$0xff]  ;;  %v488_v6 = vld [vmem:[%s402_s23 + $0x8] sm:$0xff]  ;;  %v552_v27 = vshrl.u32 %v551_v26, 7  ;;  %p1861_p6 = scmp.ne.s32.totalorder %s1841_s12, 0 }
  0xf3   : > { %v493_v7 = vsub.f32 %v483_v3, %v487_v5  ;;  %v494_v8 = vsub.f32 %v484_v4, %v488_v6  ;;  %v489_v9 = vld [vmem:[%s411_s1] sm:$0xff]  ;;  %v490_v10 = vld [vmem:[%s411_s1 + $0x8] sm:$0xff]  ;;  %s622_s1 = sshll.u32 %s1708_s21, 4  ;;  %s1728_s1 = int_to_ptr.vmem [resolvable:$true] %s622_s1 }
  0xf4   : > { %v485_v11 = vld [vmem:[%s393_s13] sm:$0xff]  ;;  %v486_v12 = vld [vmem:[%s393_s13 + $0x8] sm:$0xff]  ;;  %v497_v15 = vsub.f32 %v491_v1, %v489_v9  ;;  %v498_v16 = vsub.f32 %v492_v2, %v490_v10  ;;  %v557_v30 = vsub.s32 1, %v552_v27  ;;  %v553_v32 = vsub.s32 0, %v552_v27 }
  0xf5   : > { %576 = vrot.lane.b32.xlu1 %v492_v2, %s1325_s6  ;;  %539 = vrot.lane.b32.xlu0 %v492_v2, %s1326_s8  ;;  %v499_v13 = vmul.f32 %v493_v7, %v493_v7  ;;  %v500_v14 = vmul.f32 %v494_v8, %v494_v8  ;;  %v495_v17 = vsub.f32 %v485_v11, %v483_v3  ;;  %v549_v31 = vld [vmem:[#allocation2] sm:$0x3] }
  0xf6   : > { %v496_v18 = vsub.f32 %v486_v12, %v484_v4  ;;  %v523_v20 = vmul.f32 %v497_v15, %v497_v15  ;;  %v524_v21 = vmul.f32 %v498_v16, %v498_v16  ;;  %v558_v34 = vrot.slane %v549_v31, %v557_v30 }
  0xf7   : > { %v501_v19 = vadd.f32 %v500_v14, %v499_v13  ;;  %v511_v22 = vmul.f32 %v495_v17, %v495_v17  ;;  %v554_v42 = vrot.slane %v549_v31, %v553_v32  ;;  %s850_s27 = sshll.u32 %s1858_s3, 4  ;;  %s1860_s6 = smov %s1859_s28 }
  0xf8   : > { %v512_v23 = vmul.f32 %v496_v18, %v496_v18  ;;  %v525_v24 = vadd.f32 %v524_v21, %v523_v20  ;;  %s1726_s8 = scalar_lea.hbm %s1859_s28, %s850_s27  ;;  %s1327_s3 = smov [#allocation13]  }
  0xfa   : > { %v513_v25 = vadd.f32 %v512_v23, %v511_v22 }
 0x114   : > { %502 = vadd.xlane.f32.xlu0 %v501_v19 }
 0x118   : > { %526 = vadd.xlane.f32.xlu0 %v525_v24  ;;  %v598_v24 = vld [vmem:[%s1708_s21] sm:$0x1] }
 0x119   : > { %514 = vadd.xlane.f32.xlu1 %v513_v25 }
 0x163   : > { %v575_v28 = vpop.permute.xlu1 %574  ;;  %v538_v29 = vpop.permute.xlu0 %537 }
 0x167   : > { %v577_v33 = vpop.permute.xlu1 %576  ;;  %v540_v35 = vpop.permute.xlu0 %539 }
 0x168   : > { %v579_v36 = vsel %vm578_vm0, %v575_v28, %v577_v33  ;;  %v583_v37 = vsub.f32 %v492_v2, %v577_v33  ;;  %v542_v38 = vsel %vm541_vm1, %v538_v29, %v540_v35  ;;  %v546_v39 = vsub.f32 %v492_v2, %v540_v35 }
 0x169   : > { %v582_v40 = vsub.f32 %v491_v1, %v579_v36  ;;  %v545_v41 = vsub.f32 %v491_v1, %v542_v38 }
 0x16a   : > { %v585_v43 = vmul.f32 %v583_v37, %v583_v37  ;;  %v548_v44 = vmul.f32 %v546_v39, %v546_v39 }
 0x16b   : > { %v584_v45 = vmul.f32 %v582_v40, %v582_v40  ;;  %v547_v46 = vmul.f32 %v545_v41, %v545_v41 }
 0x16c   : > { %v562_v47 = vmul.f32 %v558_v34, %v548_v44  ;;  %v586_v48 = vsel %vm578_vm0, %v585_v43, 0.0 }
 0x16d   : > { %v587_v49 = vadd.f32 %v586_v48, %v584_v45  ;;  %v561_v50 = vmul.f32 %v554_v42, %v547_v46 }
 0x16e   : > { %v563_v51 = vsel %vm541_vm1, %v562_v47, 0.0 }
 0x16f   : > { %588 = vadd.xlane.f32.xlu1 %v587_v49  ;;  %v564_v52 = vadd.f32 %v563_v51, %v561_v50 }
 0x171   : > { %565 = vadd.xlane.f32.xlu0 %v564_v52 }
 0x1a1   : > { %v503_v53 = vpop.xlane.xlu0 %502 }
 0x1a2   : > { %v504_v54 = vrot.slane %v503_v53, 4 }
 0x1a4   : > { %v505_v55 = vadd.f32 %v504_v54, %v503_v53 }
 0x1a5   : > { %v527_v56 = vpop.xlane.xlu0 %526 }
 0x1a6   : > { %v506_v57 = vrot.slane %v505_v55, 2  ;;  %v515_v58 = vpop.xlane.xlu1 %514  ;;  %v528_v59 = vrot.slane %v527_v56, 4 }
 0x1a7   : > { %v516_v60 = vrot.slane %v515_v58, 4 }
 0x1a8   : > { %v529_v61 = vadd.f32 %v528_v59, %v527_v56  ;;  %v507_v62 = vadd.f32 %v506_v57, %v505_v55 }
 0x1a9   : > { %v517_v63 = vadd.f32 %v516_v60, %v515_v58 }
 0x1aa   : > { %v530_v0 = vrot.slane %v529_v61, 2  ;;  %v508_v1 = vrot.slane %v507_v62, 1 }
 0x1ab   : > { %v518_v2 = vrot.slane %v517_v63, 2 }
 0x1ac   : > { %v509_v3 = vadd.f32 %v508_v1, %v507_v62  ;;  %v531_v4 = vadd.f32 %v530_v0, %v529_v61 }
 0x1ad   : > { %v519_v5 = vadd.f32 %v518_v2, %v517_v63 }
 0x1ae   : > { %858 = vpush %v509_v3  ;;  %v532_v6 = vrot.slane %v531_v4, 1 }
 0x1af   : > { %v520_v7 = vrot.slane %v519_v5, 1 }
 0x1b0   : > { %v533_v8 = vadd.f32 %v532_v6, %v531_v4 }
 0x1b1   : > { %v521_v9 = vadd.f32 %v520_v7, %v519_v5 }
 0x1b3   : > { %860 = vpush %v521_v9 }
 0x1b4   : > { %862 = vpush %v533_v8 }
 0x1df   : > { %s859_s29 = spop %858 }
 0x1e0   : > { %s599_s10 = smul.f32 0.00012207031, %s859_s29  ;;  %s610_s29 = scalar_lea.sflag [#allocation4], %s466_s19 }
 0x1e4   : > { %s861_s18 = spop %860 }
 0x1e5   : > { %s600_s30 = smul.f32 0.012207031, %s861_s18  ;;  %s863_s20 = spop %862 }
 0x1e6   : > { %s602_s16 = smul.f32 6.1035156e-05, %s863_s20  ;;  %s1182_s18 = scalar_lea.vmem %s1728_s1, 16 }
 0x1e7   : > { %s601_s17 = sadd.f32 %s600_s30, %s599_s10  ;;  %p1183_p13 = scmp.ne.s32.totalorder %s1728_s1, %s1182_s18 }
 0x1e8   : > { %s1186_s10 = sshll.u32 %s1327_s3, 4  ;;  %s1187_s10 = int_to_ptr.vmem [resolvable:$false] %s1186_s10 }
 0x1e9   : > { %s603_s9 = sadd.f32 %s602_s16, %s601_s17  ;;  %p1184_p3 = pnand %p1183_p13, %p1861_p6 }
 0x1ea   : > { %s1188_s30 = scalar_lea.vmem %s1187_s10, 32  ;;  %p1189_p2 = scmp.lt.s32.totalorder %s1728_s1, %s1187_s10 }
 0x1eb   : > { %p1185_p10 = pneg %p1184_p3  ;;  %p1190_p5 = scmp.lt.s32.totalorder %s1188_s30, %s1182_s18 }
 0x1ed   : > { %p1191_p8 = por %p1190_p5, %p1189_p2 }
 0x1ef   : > { %p1192_p0 = pnand %p1191_p8, %p1185_p10 }
 0x1fc   : > { %v589_v10 = vpop.xlane.xlu1 %588 }
 0x1fd   : > { %v590_v11 = vrot.slane %v589_v10, 4 }
 0x1fe   : > { %v566_v12 = vpop.xlane.xlu0 %565 }
 0x1ff   : > { %v591_v13 = vadd.f32 %v590_v11, %v589_v10  ;;  %v567_v14 = vrot.slane %v566_v12, 4 }
 0x201   : > { %v592_v15 = vrot.slane %v591_v13, 2  ;;  %v568_v16 = vadd.f32 %v567_v14, %v566_v12 }
 0x203   : > { %v593_v17 = vadd.f32 %v592_v15, %v591_v13  ;;  %v569_v18 = vrot.slane %v568_v16, 2 }
 0x205   : > { %v570_v19 = vadd.f32 %v569_v18, %v568_v16  ;;  %v594_v20 = vrot.slane %v593_v17, 1 }
 0x207   : > { %v571_v21 = vrot.slane %v570_v19, 1  ;;  %v595_v23 = vadd.f32 %v594_v20, %v593_v17 }
 0x209   : > { %v572_v22 = vadd.f32 %v571_v21, %v570_v19 }
 0x20b   : > { %864 = vpush %v572_v22 }
 0x20c   : > { %866 = vpush %v595_v23 }
 0x23c   : > { %s865_s15 = spop %864 }
 0x23d   : > { %s867_s2 = spop %866 }
 0x23e   : > { %s597_s11 = sadd.f32 %s867_s2, %s865_s15 }
 0x240   : > { %s604_s13 = smul.f32 0.001, %s597_s11 }
 0x242   : > { %s605_s23 = sadd.f32 %s604_s13, %s603_s9 }
 0x244   : > { %v606_v25 = vstv %s605_s23 }
 0x245   : > { %v607_v26 = vadd.f32 %v606_v25, %v598_v24 }
 0x247   : > { %608 = vst [vmem:[%s1708_s21] sm:$0x1] %v607_v26 }
 0x248   : > { %1195 = shalt.err (!%p1192_p0)
}
 0x249   : > { %s1196_s19 = scalar_lea.hbm %s1726_s8, 16  ;;  %s1200_s16 = scalar_lea.hbm %s1860_s6, 32 }
 0x24a   : > { %p1197_p1 = scmp.ne.s32.totalorder %s1726_s8, %s1196_s19  ;;  %p1201_p12 = scmp.lt.u32.totalorder %s1726_s8, %s1860_s6 }
 0x24b   : > { %p1202_p11 = scmp.lt.u32.totalorder %s1200_s16, %s1196_s19  ;;  %p1204_p13 = scmp.lt.u32.totalorder %s1196_s19, %s1726_s8 }
 0x24c   : > { %p1198_p7 = pnand %p1197_p1, %p1861_p6 }
 0x24d   : > { %p1203_p9 = por %p1202_p11, %p1201_p12 }
 0x24e   : > { %p1199_p4 = pneg %p1198_p7 }
 0x24f   : > { %p1205_p3 = por %p1204_p13, %p1203_p9 }
 0x251   : > { %p1206_p10 = pnand %p1205_p3, %p1199_p4 }
 0x253   : > { %1209 = shalt.err (!%p1206_p10)
}
 0x254   : > { %882 = dma.vmem_to_hbm [thread:$0]  (%p1861_p6), %s1728_s1, 16, %s1726_s8, %s610_s29  }
 0x255 PF: > { %s1862_s2 = sld [smem:[#allocation19_spill]]  ;;  %s1863_s11 = sld [smem:[#allocation29_spill]] }
 0x256   : > { %p911_p2 = scmp.ge.s32.totalorder %s1316_s7, 2 }
 0x25b   : > { %s634_s9 = sand.u32 1, %s1862_s2   ;;  %p1864_p5 = scmp.ne.s32.totalorder %s1863_s11, 0 }
 0x25c   : > { %s635_s13 = scalar_lea.sflag [#allocation4], %s634_s9 }
 0x25d   : > { %p905_p8 = pnand %p911_p2, %p1864_p5 }
 0x25f   : > { %1271 = dma.done.wait (!%p905_p8), %s635_s13, 16  }
 0x260   : > { %1273 = vsyncadd (!%p905_p8), %s635_s13, 4294967280  ;;  %s29_s7 = sadd.s32 1, %s1316_s7   ;;  %s1865_s27 = sld [smem:[#allocation20_spill]] }
 0x261   : > { %p26_p0 = scmp.ge.s32.totalorder %s29_s7, 6   ;;  %s1866_s23 = sld [smem:[#allocation28_spill]] }
 0x262   : > { %s1867_s12 = sld [smem:[#allocation27_spill]]  ;;  %s1868_s1 = sld [smem:[#allocation23_spill]] }
 0x263   : > { %s1869_s28 = sld [smem:[#allocation24_spill]]  ;;  %s1870_s29 = sld [smem:[#allocation25_spill]] }
 0x264   : > { %s1871_s30 = sld [smem:[#allocation26_spill]]  ;;  %s1872_s21 = smov %s1280_s22 }
 0x265   : > { %s1874_s24 = smov %s1292_s25  ;;  %s1875_s25 = smov %s1296_s26 }
 0x266   : > { %s1873_s22 = smov %s1865_s27  ;;  %28 = sbr.rel (!%p26_p0) target bundleno = 19 (0x13), region = 146 }
 0x268   : > { %s1876_s26 = smov %s1867_s12  ;;  %s1877_s27 = smov %s1868_s1 }
 0x26d   :  { %639 = vsyncpa [#allocation3], 1 }
 0x26e   :  { %641 = vsyncpa [#allocation3 + $0x1], 1 }
 0x26f   :  { %642 = vsyncpa [#allocation6], 1 }
 0x270   :  { %644 = vsyncpa [#allocation6 + $0x1], 1 }
 0x271   :  { %645 = vsyncpa [#allocation9], 1 }
 0x272   :  { %647 = vsyncpa [#allocation9 + $0x1], 1 }
 0x273   :  { %648 = vsyncpa [#allocation12], 1 }
 0x274   :  { %650 = vsyncpa [#allocation12 + $0x1], 1 }
 0x275   :  { %651 = vsyncpa [#allocation4], 1 }
 0x276   :  { %653 = vsyncpa [#allocation4 + $0x1], 1 }

</bundles_post_ra>
